<compile_context>
chip_gen: v6e
topology: v6e:2x2x1
jax: 0.10.0
libtpu: 0.0.40
codegen_flags: <defaults>
</compile_context>

<pallas_src>
import functools

import jax
import jax.numpy as jnp
from jax.experimental import pallas as pl
from jax.experimental.pallas import tpu as pltpu


def _ce_label_smooth_kernel(logits_ref, targets_ref, loss_ref, *, epsilon):
    # logits_ref: (TB, C) float, targets_ref: (TB, 1) int32, loss_ref: (TB, 1) f32
    x = logits_ref[...].astype(jnp.float32)                 # (TB, C) f32 compute
    t = targets_ref[...]                                    # (TB, 1) int32
    TB, C = x.shape

    # Numerically stable logsumexp; (x - m) only ever feeds exp (fused).
    m = jnp.max(x, axis=1, keepdims=True)                                  # (TB,1)
    lse = m + jnp.log(jnp.sum(jnp.exp(x - m), axis=1, keepdims=True))      # (TB,1)

    # Smoothed-target weights sum to 1, hence loss = lse - sum(w * x).
    # Out-of-range targets (e.g. ignore_index=-1) match no class and simply
    # drop the (1-eps) term (same as jax.nn.one_hot, unlike torch scatter_).
    class_ids = jax.lax.broadcasted_iota(jnp.int32, (TB, C), 1)
    uniform = epsilon / C
    w_x = jnp.where(class_ids == t, (1.0 - epsilon) + uniform, uniform) * x
    loss_ref[...] = lse - jnp.sum(w_x, axis=1, keepdims=True)


def _choose_block_b(B, C):
    """Pick the batch tile TB.

    Budget is counted against the f32 compute dtype (4 B/elem) no matter the
    input itemsize, ~8 MiB of logits per buffer (good HBM roofline on v7x and
    still comfortable on v5e/v6e with the 48 MiB scoped-VMEM limit below), TB
    a multiple of 8, and TB capped so the batch axis has at least two grid
    steps when B allows it (so both v7x TensorCores receive work).
    """
    per_buffer_budget = 8 * 1024 * 1024          # bytes, at f32 compute dtype
    tb = per_buffer_budget // max(1, C * 4)
    tb = max(8, (tb // 8) * 8)

    b_round = ((B + 7) // 8) * 8
    if b_round > 8:
        half = (((b_round // 2) + 7) // 8) * 8   # >= 2 tiles when possible
        tb = min(tb, half)
    return max(8, min(tb, b_round))


def _xla_forward(logits, targets, num_classes, epsilon):
    """Plain-XLA per-sample loss (fast path for tiny class counts)."""
    log_probs = jax.nn.log_softmax(logits.astype(jnp.float32), axis=1)
    one_hot = jax.nn.one_hot(targets, num_classes, dtype=jnp.float32)
    smoothed = (1.0 - epsilon) * one_hot + epsilon / num_classes
    return -(smoothed * log_probs).sum(axis=1)


def cross_entropy_label_smooth(logits, targets, num_classes, epsilon=0.1,
                               reduction=True, block_b=None, force_pallas=False):
    """Pallas TPU implementation of CrossEntropyLabelSmooth.forward.

    logits:  (B, num_classes) float (f32 or bf16)
    targets: (B,) integer class indices
    """
    B, C = logits.shape
    assert C == num_classes

    # Fast path: with C < 128 the lane axis (classes) is mostly idle, so the
    # kernel cannot beat plain XLA; skip pallas_call unless forced.
    if C < 128 and not force_pallas:
        loss = _xla_forward(logits, targets, num_classes, epsilon)
        return jnp.mean(loss) if reduction else loss

    tb = block_b if block_b is not None else _choose_block_b(B, C)
    num_tiles = pl.cdiv(B, tb)
    B_pad = num_tiles * tb

    # Do NOT pad the logits (avoids a full HBM copy of a bandwidth-bound
    # stream); the last partial block reads garbage rows which stay confined
    # to their own per-row reductions and are sliced off below.  Only the
    # tiny targets column is padded.
    targets_2d = targets.astype(jnp.int32).reshape(B, 1)
    if B_pad != B:
        targets_2d = jnp.pad(targets_2d, ((0, B_pad - B), (0, 0)))

    kernel = functools.partial(_ce_label_smooth_kernel, epsilon=float(epsilon))

    per_sample = pl.pallas_call(
        kernel,
        out_shape=jax.ShapeDtypeStruct((B_pad, 1), jnp.float32),
        grid=(num_tiles,),
        in_specs=[
            pl.BlockSpec((tb, C), lambda i: (i, 0)),
            pl.BlockSpec((tb, 1), lambda i: (i, 0)),
        ],
        out_specs=pl.BlockSpec((tb, 1), lambda i: (i, 0)),
        compiler_params=pltpu.CompilerParams(
            dimension_semantics=("parallel",),
            vmem_limit_bytes=48 * 1024 * 1024,
        ),
    )(logits, targets_2d)

    loss = per_sample[:B, 0]  # drop garbage rows from the partial final block
    return jnp.mean(loss) if reduction else loss


def _reference(logits, targets, num_classes, epsilon=0.1, reduction=True):
    loss = _xla_forward(logits, targets, num_classes, epsilon)
    return loss.mean() if reduction else loss


def _check(out, ref, atol=1e-5, rtol=1e-4):
    assert jnp.allclose(out, ref, atol=atol, rtol=rtol), (out, ref)


if __name__ == "__main__":
    key = jax.random.PRNGKey(0)
    k1, k2, k3, k4, k5, k6 = jax.random.split(key, 6)
    eps = 0.1

    # Case 1: tiny class count (C < 128) -> XLA fast path; also force the
    # Pallas path once to check the kernel at small C.
    B1, C1 = 8, 16
    logits1 = jax.random.normal(k1, (B1, C1), dtype=jnp.float32)
    targets1 = jax.random.randint(k2, (B1,), 0, C1, dtype=jnp.int32)
    for red in (True, False):
        ref = _reference(logits1, targets1, C1, eps, reduction=red)
        out = jax.block_until_ready(
            cross_entropy_label_smooth(logits1, targets1, C1, eps, reduction=red))
        _check(out, ref)
        out_p = jax.block_until_ready(
            cross_entropy_label_smooth(logits1, targets1, C1, eps,
                                       reduction=red, force_pallas=True))
        _check(out_p, ref)

    # Case 2: aligned batch, C >= 128 -> Pallas path with 2 grid tiles.
    B2, C2 = 32, 128
    logits2 = jax.random.normal(k3, (B2, C2), dtype=jnp.float32)
    targets2 = jax.random.randint(k4, (B2,), 0, C2, dtype=jnp.int32)
    for red in (True, False):
        ref2 = _reference(logits2, targets2, C2, eps, reduction=red)
        out2 = jax.block_until_ready(
            cross_entropy_label_smooth(logits2, targets2, C2, eps, reduction=red))
        _check(out2, ref2)

    # Case 3: ragged batch + bf16 logits -> partial final block (no HBM pad of
    # logits), f32 compute inside the kernel.
    B3, C3 = 26, 256
    logits3 = jax.random.normal(k5, (B3, C3)).astype(jnp.bfloat16)
    targets3 = jax.random.randint(k6, (B3,), 0, C3, dtype=jnp.int32)
    for red in (True, False):
        ref3 = _reference(logits3, targets3, C3, eps, reduction=red)
        out3 = jax.block_until_ready(
            cross_entropy_label_smooth(logits3, targets3, C3, eps, reduction=red))
        _check(out3, ref3)

    print("KERNEL_OK")
</pallas_src>

<mosaic_0001>
module attributes {stable_mosaic.version = 11 : i64} {
  func.func @_ce_label_smooth_kernel(%arg0: i32, %arg1: memref<8x16xf32, #tpu.memory_space<vmem>>, %arg2: memref<8x1xi32, #tpu.memory_space<vmem>>, %arg3: memref<8x1xf32, #tpu.memory_space<vmem>>) attributes {dimension_semantics = [#tpu.dimension_semantics<parallel>], iteration_bounds = array<i64: 1>, scalar_prefetch = 0 : i64, scratch_operands = 0 : i64, tpu.core_type = #tpu.core_type<tc>, window_params = [{transform_indices = @transform_0, window_bounds = array<i64: 8, 16>}, {transform_indices = @transform_1, window_bounds = array<i64: 8, 1>}, {transform_indices = @transform_2, window_bounds = array<i64: 8, 1>}]} {
    %c0 = arith.constant 0 : index
    %c0_0 = arith.constant 0 : index
    %0 = vector.load %arg1[%c0, %c0_0] : memref<8x16xf32, #tpu.memory_space<vmem>>, vector<8x16xf32>
    %c0_1 = arith.constant 0 : index
    %c0_2 = arith.constant 0 : index
    %1 = vector.load %arg2[%c0_1, %c0_2] : memref<8x1xi32, #tpu.memory_space<vmem>>, vector<8x1xi32>
    %cst = arith.constant dense<0xFF800000> : vector<8xf32>
    %2 = vector.multi_reduction <maximumf>, %0, %cst [1] : vector<8x16xf32> to vector<8xf32>
    %3 = vector.shape_cast %2 : vector<8xf32> to vector<8x1xf32>
    %4 = vector.broadcast %3 : vector<8x1xf32> to vector<8x16xf32>
    %5 = arith.subf %0, %4 : vector<8x16xf32>
    %6 = math.exp %5 : vector<8x16xf32>
    %cst_3 = arith.constant dense<0.000000e+00> : vector<8xf32>
    %7 = vector.multi_reduction <add>, %6, %cst_3 [1] : vector<8x16xf32> to vector<8xf32>
    %8 = vector.shape_cast %7 : vector<8xf32> to vector<8x1xf32>
    %9 = math.log %8 : vector<8x1xf32>
    %10 = arith.addf %3, %9 : vector<8x1xf32>
    %11 = tpu.iota {dimensions = array<i32: 1>} : vector<8x16xi32>
    %12 = vector.broadcast %1 : vector<8x1xi32> to vector<8x16xi32>
    %13 = arith.cmpi eq, %11, %12 : vector<8x16xi32>
    %cst_4 = arith.constant 9.062500e-01 : f32
    %cst_5 = arith.constant 6.250000e-03 : f32
    %14 = vector.broadcast %cst_4 : f32 to vector<8x16xf32>
    %15 = vector.broadcast %cst_5 : f32 to vector<8x16xf32>
    %16 = arith.select %13, %14, %15 : vector<8x16xi1>, vector<8x16xf32>
    %17 = arith.mulf %16, %0 : vector<8x16xf32>
    %cst_6 = arith.constant dense<0.000000e+00> : vector<8xf32>
    %18 = vector.multi_reduction <add>, %17, %cst_6 [1] : vector<8x16xf32> to vector<8xf32>
    %19 = vector.shape_cast %18 : vector<8xf32> to vector<8x1xf32>
    %20 = arith.subf %10, %19 : vector<8x1xf32>
    %c0_7 = arith.constant 0 : index
    %c0_8 = arith.constant 0 : index
    %21 = vector.load %arg3[%c0_7, %c0_8] : memref<8x1xf32, #tpu.memory_space<vmem>>, vector<8x1xf32>
    tpu.vector_store %arg3[%c0_7, %c0_8], %20 {strides = array<i32>} : memref<8x1xf32, #tpu.memory_space<vmem>>, vector<8x1xf32>,
    return
  }
  func.func @transform_0(%arg0: i32) -> (i32, i32) {
    %c0_i32 = arith.constant 0 : i32
    %c0_i32_0 = arith.constant 0 : i32
    return %arg0, %c0_i32 : i32, i32
  }
  func.func @transform_1(%arg0: i32) -> (i32, i32) {
    %c0_i32 = arith.constant 0 : i32
    %c0_i32_0 = arith.constant 0 : i32
    return %arg0, %c0_i32 : i32, i32
  }
  func.func @transform_2(%arg0: i32) -> (i32, i32) {
    %c0_i32 = arith.constant 0 : i32
    %c0_i32_0 = arith.constant 0 : i32
    return %arg0, %c0_i32 : i32, i32
  }
}

</mosaic_0001>

<bundles_post_ra>
// kernel: tpu_custom_call.1
= control target key start
LH: loop header
LB: loop body
LE: loop exit
PB: predicated region body
PF: predicated region fallthrough
CT: control target
= control target key end

     0   :  { %vm13_vm0 = vcmask 130048   ;;  %v51_v1 = vmov 0   ;;  %v26_v7 = vlaneseq  ;;  %v52_v10 = vmov 0.00625   ;;  %s80_s0 = inlined_call_operand.vmem [shape: f32[8,16], index: 0, kind: input, shape index: {}]   ;;  %s81_s1 = inlined_call_operand.vmem [shape: s32[8,1], index: 1, kind: input, shape index: {}]   ;;  %s82_s2 = inlined_call_operand.vmem [shape: f32[8,1], index: 2, kind: output, shape index: {}]  }
   0x1   :  { %v11_v0 = vld [vmem:[%s80_s0] sm:$0xff]  ;;  %46 = vset.pattern.permute.xlu0 %v51_v1  ;;  %vm38_vm2 = vcmask 7168  }
   0x2   :  { %v14_v2 = vsel %vm13_vm0, %v11_v0, -inf  ;;  %v12_v3 = vld [vmem:[%s81_s1] sm:$0xff]  ;;  %v27_v8 = vand.u32 127, %v26_v7 }
   0x3   :  { %15 = vmax.xlane.f32.xlu0 %v14_v2 }
  0x19   :  { %29 = vperm.xlu0 %46, %v12_v3  }
  0x8c   :  { %v16_v4 = vpop.xlane.xlu0 %15 }
  0x8d   :  { %v17_v5 = vsub.f32 %v11_v0, %v16_v4 }
  0x8f   :  { %v18_v6 = vmul.f32 1.442695, %v17_v5 }
  0x91   :  { %47 = vpow2.f32 %v18_v6 }
  0x94   :  { %v30_v9 = vpop.permute.xlu0 %29 }
  0x95   :  { %vm31_vm1 = vcmp.eq.s32.totalorder %v27_v8, %v30_v9 }
  0x96   :  { %v32_v11 = vsel %vm31_vm1, 0.90625, %v52_v10 }
  0x97   :  { %v33_v12 = vmul.f32 %v32_v11, %v11_v0 }
  0x99   :  { %v34_v15 = vsel %vm13_vm0, %v33_v12, 0.0 }
  0x9e   :  { %v48_v13 = vpop.eup %47 }
  0x9f   :  { %v20_v14 = vsel %vm13_vm0, %v48_v13, 0.0 }
  0xa0   :  { %21 = vadd.xlane.f32.xlu1 %v20_v14 }
  0xa4   :  { %35 = vadd.xlane.f32.xlu1 %v34_v15 }
 0x129   :  { %v22_v16 = vpop.xlane.xlu1 %21 }
 0x12a   :  { %49 = vlog2.f32 %v22_v16 }
 0x12d   :  { %v36_v19 = vpop.xlane.xlu1 %35 }
 0x137   :  { %v50_v17 = vpop.eup %49 }
 0x138   :  { %v24_v18 = vmul.f32 0.6931472, %v50_v17 }
 0x13a   :  { %v25_v20 = vadd.f32 %v24_v18, %v16_v4 }
 0x13c   :  { %v37_v21 = vsub.f32 %v25_v20, %v36_v19 }
 0x13e   :  { %39 = vst.msk [vmem:[%s82_s2] sm:$0xff] %vm38_vm2, %v37_v21 }

</bundles_post_ra>
